<compile_context>
chip_gen: v7x
topology: tpu7x:2x2x1
jax: 0.10.0
libtpu: 0.0.40
codegen_flags: <defaults>
</compile_context>

<pallas_src>
import functools
import math

import jax
import jax.numpy as jnp
from jax.experimental import pallas as pl
from jax.experimental.pallas import tpu as pltpu


def _gnn_kernel(x_ref, adj_ref, w1_ref, b1_ref, w2_ref, b2_ref, o_ref, *,
                f_out):
    adj = adj_ref[...]

    # ---- GC layer 1 (reassociated): relu((adj @ x) @ W1 + b1) ----
    ax = jnp.dot(adj, x_ref[...], preferred_element_type=jnp.float32)
    h = jnp.dot(ax, w1_ref[...], preferred_element_type=jnp.float32)
    h = jnp.maximum(h + b1_ref[...], 0.0)

    # ---- dropout: identity (inference / eval semantics) ----

    # ---- GC layer 2: adj @ (h @ W2) + b2  (W2/b2 are lane-padded to 128) ----
    support2 = jnp.dot(h, w2_ref[...], preferred_element_type=jnp.float32)
    logits = jnp.dot(adj, support2, preferred_element_type=jnp.float32)
    logits = logits + b2_ref[...]

    # ---- log_softmax along features, masking the padded lanes ----
    lane = jax.lax.broadcasted_iota(jnp.int32, logits.shape, 1)
    valid = lane < f_out
    logits_m = jnp.where(valid, logits, jnp.float32(-1e30))
    m = jnp.max(logits_m, axis=-1, keepdims=True)
    shifted = logits_m - m                      # padded lanes ≈ -1e30
    lse = jnp.log(jnp.sum(jnp.exp(shifted), axis=-1, keepdims=True))
    o_ref[...] = (shifted - lse).astype(o_ref.dtype)   # lane-dense full store


def _round_up(v, m):
    return (v + m - 1) // m * m


@jax.jit
def gnn_forward(x, adj, w1, b1, w2, b2):
    """Full GNN.forward as a single fused Pallas kernel.

    x:   (N, F_in)       adj: (N, N)
    w1:  (F_in, H)       b1:  (H,)
    w2:  (H, F_out)      b2:  (F_out,)
    returns (N, F_out) log-probabilities.
    """
    n, f_in = x.shape
    hid = w1.shape[1]
    f_out = w2.shape[1]

    # Pad node rows to a multiple of 8 (sublanes) and the output feature dim
    # to a multiple of 128 (lanes) so the final store is unmasked/lane-dense.
    n_pad = _round_up(max(n, 8), 8)
    f_out_pad = _round_up(f_out, 128)

    x_p = jnp.pad(x, ((0, n_pad - n), (0, 0)))
    adj_p = jnp.pad(adj, ((0, n_pad - n), (0, n_pad - n)))
    w2_p = jnp.pad(w2, ((0, 0), (0, f_out_pad - f_out)))
    b1_2d = b1.reshape(1, hid)
    b2_2d = jnp.pad(b2, (0, f_out_pad - f_out)).reshape(1, f_out_pad)

    flops = (2 * n_pad * n_pad * f_in + 2 * n_pad * f_in * hid      # layer 1
             + 2 * n_pad * hid * f_out_pad                          # h @ W2
             + 2 * n_pad * n_pad * f_out_pad)                       # adj @ s2
    bytes_accessed = 4 * (x_p.size + adj_p.size + w1.size + b1_2d.size
                          + w2_p.size + b2_2d.size + n_pad * f_out_pad)
    cost = pl.CostEstimate(flops=flops,
                           transcendentals=n_pad * (f_out_pad + 1),
                           bytes_accessed=bytes_accessed)

    vmem = pl.BlockSpec(memory_space=pltpu.MemorySpace.VMEM)
    out_pad = pl.pallas_call(
        functools.partial(_gnn_kernel, f_out=f_out),
        out_shape=jax.ShapeDtypeStruct((n_pad, f_out_pad), jnp.float32),
        in_specs=[vmem, vmem, vmem, vmem, vmem, vmem],
        out_specs=vmem,
        cost_estimate=cost,
    )(x_p, adj_p, w1, b1_2d, w2_p, b2_2d)

    return out_pad[:n, :f_out].astype(x.dtype)


def xavier_uniform(key, shape, dtype=jnp.float32):
    """Matches torch.nn.init.xavier_uniform_ (gain=1) for a 2-D weight."""
    fan_in, fan_out = shape
    limit = math.sqrt(6.0 / (fan_in + fan_out))
    return jax.random.uniform(key, shape, dtype, minval=-limit, maxval=limit)


if __name__ == "__main__":
    # Shapes from the reference script: 5 nodes, GNN(input_dim=3,
    # hidden_dim=16, output_dim=6).
    N, F_IN, HID, F_OUT = 5, 3, 16, 6

    key = jax.random.PRNGKey(0)
    kx, kadj, kw1, kw2 = jax.random.split(key, 4)

    x = jax.random.normal(kx, (N, F_IN), dtype=jnp.float32)
    adj = jax.random.normal(kadj, (N, N), dtype=jnp.float32)

    # Deterministic parameter init mirroring reset_parameters().
    w1 = xavier_uniform(kw1, (F_IN, HID))
    b1 = jnp.zeros((HID,), dtype=jnp.float32)
    w2 = xavier_uniform(kw2, (HID, F_OUT))
    b2 = jnp.zeros((F_OUT,), dtype=jnp.float32)

    out = gnn_forward(x, adj, w1, b1, w2, b2)
    out = jax.block_until_ready(out)

    # Plain-JAX reference of the PyTorch forward (dropout = identity).
    h_ref = jnp.maximum(adj @ (x @ w1) + b1, 0.0)
    logits_ref = adj @ (h_ref @ w2) + b2
    ref = jax.nn.log_softmax(logits_ref, axis=1)

    assert out.shape == (N, F_OUT)
    assert jnp.allclose(out, ref, atol=1e-5, rtol=1e-5)

    print("KERNEL_OK")
</pallas_src>

<mosaic_0001>
module attributes {stable_mosaic.version = 11 : i64} {
  func.func @_gnn_kernel(%arg0: memref<8x3xf32, #tpu.memory_space<vmem>>, %arg1: memref<8x8xf32, #tpu.memory_space<vmem>>, %arg2: memref<3x16xf32, #tpu.memory_space<vmem>>, %arg3: memref<1x16xf32, #tpu.memory_space<vmem>>, %arg4: memref<16x128xf32, #tpu.memory_space<vmem>>, %arg5: memref<1x128xf32, #tpu.memory_space<vmem>>, %arg6: memref<8x128xf32, #tpu.memory_space<vmem>>) attributes {dimension_semantics = [], scalar_prefetch = 0 : i64, scratch_operands = 0 : i64, tpu.core_type = #tpu.core_type<tc>} {
    %c0 = arith.constant 0 : index
    %c0_0 = arith.constant 0 : index
    %0 = vector.load %arg1[%c0, %c0_0] : memref<8x8xf32, #tpu.memory_space<vmem>>, vector<8x8xf32>
    %c0_1 = arith.constant 0 : index
    %c0_2 = arith.constant 0 : index
    %1 = vector.load %arg0[%c0_1, %c0_2] : memref<8x3xf32, #tpu.memory_space<vmem>>, vector<8x3xf32>
    %cst = arith.constant dense<0.000000e+00> : vector<8x3xf32>
    %2 = tpu.matmul %0, %1, %cst {dimension_numbers = #tpu.dot_dimension_numbers<[1], [0], [0], [1], [0, 0, 1, 1], [], []>} : vector<8x8xf32>, vector<8x3xf32>, vector<8x3xf32> -> vector<8x3xf32>
    %c0_3 = arith.constant 0 : index
    %c0_4 = arith.constant 0 : index
    %3 = vector.load %arg2[%c0_3, %c0_4] : memref<3x16xf32, #tpu.memory_space<vmem>>, vector<3x16xf32>
    %cst_5 = arith.constant dense<0.000000e+00> : vector<8x16xf32>
    %4 = tpu.matmul %2, %3, %cst_5 {dimension_numbers = #tpu.dot_dimension_numbers<[1], [0], [0], [1], [0, 0, 1, 1], [], []>} : vector<8x3xf32>, vector<3x16xf32>, vector<8x16xf32> -> vector<8x16xf32>
    %c0_6 = arith.constant 0 : index
    %c0_7 = arith.constant 0 : index
    %5 = vector.load %arg3[%c0_6, %c0_7] : memref<1x16xf32, #tpu.memory_space<vmem>>, vector<1x16xf32>
    %6 = vector.broadcast %5 : vector<1x16xf32> to vector<8x16xf32>
    %7 = arith.addf %4, %6 : vector<8x16xf32>
    %cst_8 = arith.constant 0.000000e+00 : f32
    %8 = vector.broadcast %cst_8 : f32 to vector<8x16xf32>
    %9 = arith.maximumf %7, %8 : vector<8x16xf32>
    %c0_9 = arith.constant 0 : index
    %c0_10 = arith.constant 0 : index
    %10 = vector.load %arg4[%c0_9, %c0_10] : memref<16x128xf32, #tpu.memory_space<vmem>>, vector<16x128xf32>
    %cst_11 = arith.constant dense<0.000000e+00> : vector<8x128xf32>
    %11 = tpu.matmul %9, %10, %cst_11 {dimension_numbers = #tpu.dot_dimension_numbers<[1], [0], [0], [1], [0, 0, 1, 1], [], []>} : vector<8x16xf32>, vector<16x128xf32>, vector<8x128xf32> -> vector<8x128xf32>
    %cst_12 = arith.constant dense<0.000000e+00> : vector<8x128xf32>
    %12 = tpu.matmul %0, %11, %cst_12 {dimension_numbers = #tpu.dot_dimension_numbers<[1], [0], [0], [1], [0, 0, 1, 1], [], []>} : vector<8x8xf32>, vector<8x128xf32>, vector<8x128xf32> -> vector<8x128xf32>
    %c0_13 = arith.constant 0 : index
    %c0_14 = arith.constant 0 : index
    %13 = vector.load %arg5[%c0_13, %c0_14] : memref<1x128xf32, #tpu.memory_space<vmem>>, vector<1x128xf32>
    %14 = vector.broadcast %13 : vector<1x128xf32> to vector<8x128xf32>
    %15 = arith.addf %12, %14 : vector<8x128xf32>
    %16 = tpu.iota {dimensions = array<i32: 1>} : vector<8x128xi32>
    %c6_i32 = arith.constant 6 : i32
    %17 = vector.broadcast %c6_i32 : i32 to vector<8x128xi32>
    %18 = arith.cmpi slt, %16, %17 : vector<8x128xi32>
    %cst_15 = arith.constant -1.000000e+30 : f32
    %19 = vector.broadcast %cst_15 : f32 to vector<8x128xf32>
    %20 = arith.select %18, %15, %19 : vector<8x128xi1>, vector<8x128xf32>
    %cst_16 = arith.constant dense<0xFF800000> : vector<8xf32>
    %21 = vector.multi_reduction <maximumf>, %20, %cst_16 [1] : vector<8x128xf32> to vector<8xf32>
    %22 = vector.shape_cast %21 : vector<8xf32> to vector<8x1xf32>
    %23 = vector.broadcast %22 : vector<8x1xf32> to vector<8x128xf32>
    %24 = arith.subf %20, %23 : vector<8x128xf32>
    %25 = math.exp %24 : vector<8x128xf32>
    %cst_17 = arith.constant dense<0.000000e+00> : vector<8xf32>
    %26 = vector.multi_reduction <add>, %25, %cst_17 [1] : vector<8x128xf32> to vector<8xf32>
    %27 = vector.shape_cast %26 : vector<8xf32> to vector<8x1xf32>
    %28 = math.log %27 : vector<8x1xf32>
    %29 = vector.broadcast %28 : vector<8x1xf32> to vector<8x128xf32>
    %30 = arith.subf %24, %29 : vector<8x128xf32>
    %c0_18 = arith.constant 0 : index
    %c0_19 = arith.constant 0 : index
    %31 = vector.load %arg6[%c0_18, %c0_19] : memref<8x128xf32, #tpu.memory_space<vmem>>, vector<8x128xf32>
    tpu.vector_store %arg6[%c0_18, %c0_19], %30 {strides = array<i32>} : memref<8x128xf32, #tpu.memory_space<vmem>>, vector<8x128xf32>,
    return
  }
}

</mosaic_0001>

<bundles_post_ra>
// kernel: gnn_forward.1
= control target key start
LH: loop header
LB: loop body
LE: loop exit
PB: predicated region body
PF: predicated region fallthrough
CT: control target
= control target key end

     0   :  { %vm26_vm0 = vcmask 64512   ;;  %v442_v2 = vmov 0.0   ;;  %vm443_vm1 = vmmov 0   ;;  %s520_s0 = inlined_call_operand.vmem [shape: f32[8,3], index: 0, kind: input, shape index: {}]   ;;  %s521_s1 = inlined_call_operand.vmem [shape: f32[8,8], index: 1, kind: input, shape index: {}]   ;;  %s522_s2 = inlined_call_operand.vmem [shape: f32[3,16], index: 2, kind: input, shape index: {}]   ;;  %s523_s3 = inlined_call_operand.vmem [shape: f32[1,16], index: 3, kind: input, shape index: {}]   ;;  %s524_s4 = inlined_call_operand.vmem [shape: f32[16,128], index: 4, kind: input, shape index: {}]   ;;  %s525_s5 = inlined_call_operand.vmem [shape: f32[1,128], index: 5, kind: input, shape index: {}]   ;;  %s526_s6 = inlined_call_operand.hbm [shape: f32[8,128], index: 6, kind: output, shape index: {}]  }
   0x1   :  { %v25_v0 = vld [vmem:[%s520_s0] sm:$0xff]  ;;  %385 = vmatprep.subr.mxu0 %v442_v2  ;;  %387 = vmatprep.mubr.msk.f32.mxu0 %vm443_vm1, %v442_v2 }
   0x2   :  { %v24_v1 = vld [vmem:[%s521_s1] sm:$0xff] }
   0x3   :  { %11 = vsyncpa [#allocation3], 0  ;;  %386 = vmatpush3.msra.mxu0 %v25_v0  ;;  %390 = vmatprep.subr.mxu1 %v442_v2  ;;  %v100_v3 = vld [vmem:[%s522_s2] sm:$0x7]  ;;  %vm112_vm2 = vcmask 1042432   ;;  %vm108_vm3 = vcmask 23552   ;;  %v340_v17 = vlaneseq }
   0x4   :  { %388 = vmatmul.mubr.msk.f32.vlgmr.msra.gmra.mrb[0].mxu0 %vm26_vm0, %v24_v1  ;;  %392 = vmatprep.mubr.msk.f32.mxu1 %vm443_vm1, %v442_v2  ;;  %v187_v6 = vld [vmem:[%s524_s4] sm:$0xff]  ;;  %v188_v7 = vld [vmem:[%s524_s4 + $0x8] sm:$0xff]  ;;  %v444_v9 = vmov 0.0|0.0   ;;  %vm189_vm4 = vcmask 130048  }
   0x5   :  { %399 = vmatprep.mubr.msk.f32.mxu0 %vm443_vm1, %v442_v2  ;;  %391 = vmatpush3.msk.msra.mxu1 %vm112_vm2, %v100_v3  ;;  %v408_v8 = vpack.c.bf16 %v188_v7, %v187_v6  ;;  %v370_v10 = vld [vmem:[%s523_s3] ss:$0 sm:$0xff]  ;;  %v341_v18 = vand.u32 127, %v340_v17  ;;  %s445_s3 = smov [#allocation2]  }
   0x6   :  { %402 = vmatprep.subr.mxu1 %v442_v2  ;;  %407 = vmatprep.subr.bf16.mxu0 %v444_v9  ;;  %v374_v19 = vld [vmem:[%s525_s5] ss:$0 sm:$0xff]  ;;  %s361_s7 = sshll.u32 %s445_s3, 4  ;;  %s362_s7 = int_to_ptr.vmem [resolvable:$true] %s361_s7 }
   0x7   :  { %409 = vmatpush3.bf16.msra.mxu0 %v408_v8  ;;  %vm342_vm5 = vcmp.lt.s32.totalorder %v341_v18, 6  ;;  %s418_s5 = scalar_lea.vmem %s362_s7, 128  ;;  %p423_p1 = scmp.lt.s32.totalorder %s362_s7, %s362_s7 }
   0x8   :  { %p419_p0 = scmp.ne.s32.totalorder %s362_s7, %s418_s5  ;;  %p424_p2 = scmp.lt.s32.totalorder %s418_s5, %s418_s5 }
   0xa   :  { %p425_p3 = por %p424_p2, %p423_p1 }
   0xc   :  { %p426_p4 = pnand %p425_p3, %p419_p0 }
  0xd7   :  { %v96_v4 = vpop.f32.mrb[0].mxu0 }
  0xd8   :  { %v389_v5 = vpop.f32.mrb[1].mxu0  ;;  %393 = vmatmul.mubr.msk.f32.vlgmr.msra.gmra.mrb[0].mxu1 %vm108_vm3, %v96_v4 }
  0xd9   :  { %404 = vmatprep.mubr.msk.f32.mxu1 %vm443_vm1, %v442_v2 }
 0x1ab   :  { %v182_v11 = vpop.f32.mrb[0].mxu1 }
 0x1ac   :  { %v183_v12 = vadd.f32 %v370_v10, %v182_v11  ;;  %v394_v13 = vpop.f32.mrb[1].mxu1 }
 0x1ae   :  { %v186_v14 = vmax.f32 %v183_v12, 0.0 }
 0x1b0   :  { %400 = vmatmul.mubr.msk.f32.vlgmr.msra.gmra.mrb[2].mxu0 %vm189_vm4, %v186_v14 }
 0x283   :  { %v259_v15 = vpop.f32.mrb[2].mxu0 }
 0x284   :  { %v401_v16 = vpop.f32.mrb[3].mxu0  ;;  %403 = vmatpush3.msra.mxu1 %v259_v15 }
 0x285   :  { %405 = vmatmul.mubr.msk.f32.vlgmr.msra.gmra.mrb[2].mxu1 %vm26_vm0, %v24_v1 }
 0x358   :  { %v336_v20 = vpop.f32.mrb[2].mxu1 }
 0x359   :  { %v337_v21 = vadd.f32 %v374_v19, %v336_v20  ;;  %v406_v22 = vpop.f32.mrb[3].mxu1 }
 0x35b   :  { %v343_v23 = vsel %vm342_vm5, %v337_v21, -1e+30 }
 0x35c   :  { %344 = vmax.xlane.f32.xlu0 %v343_v23 }
 0x3e9   :  { %v345_v24 = vpop.xlane.xlu0 %344 }
 0x3ea   :  { %v346_v25 = vsub.f32 %v343_v23, %v345_v24 }
 0x3ec   :  { %v347_v26 = vmul.f32 1.442695, %v346_v25 }
 0x3ee   :  { %414 = vpow2.f32 %v347_v26 }
 0x3f8   :  { %v415_v27 = vpop.eup %414 }
 0x3f9   :  { %349 = vadd.xlane.f32.xlu0 %v415_v27 }
 0x486   :  { %v350_v28 = vpop.xlane.xlu0 %349 }
 0x487   :  { %416 = vlog2.f32 %v350_v28 }
 0x491   :  { %v417_v29 = vpop.eup %416 }
 0x492   :  { %v352_v30 = vmul.f32 0.6931472, %v417_v29 }
 0x494   :  { %v353_v31 = vsub.f32 %v346_v25, %v352_v30 }
 0x496   :  { %354 = vst [vmem:[#allocation2] sm:$0xff] %v353_v31 }
 0x497   :  { %429 = shalt.err (!%p426_p4)
}
 0x498   :  { %s430_s10 = scalar_lea.hbm %s526_s6, 128 }
 0x499   :  { %p431_p5 = scmp.ne.s32.totalorder %s526_s6, %s430_s10  ;;  %p434_p6 = scmp.lt.u32.totalorder %s430_s10, %s526_s6 }
 0x49b   :  { %p436_p7 = pnand %p434_p6, %p431_p5 }
 0x49d   :  { %439 = shalt.err (!%p436_p7)
}
 0x49e   :  { %364 = dma.vmem_to_hbm [thread:$0]  %s362_s7, 128, %s526_s6, [#allocation3]  }
 0x49f   :  { %440 = dma.done.wait [#allocation3], 128  }
 0x4a0   :  { %441 = vsyncadd [#allocation3], 4294967168 }
 0x4a1   :  { %368 = vsyncpa [#allocation3], 1 }

</bundles_post_ra>
